<compile_context>
chip_gen: v6e
topology: v6e:2x2x1
jax: 0.10.0
libtpu: 0.0.40
codegen_flags: <defaults>
</compile_context>

<pallas_src>
import functools

import jax
import jax.numpy as jnp
from jax.experimental import pallas as pl
from jax.experimental.pallas import tpu as pltpu

# Logical (PyTorch) dims.
D_IN, D_H1, D_H2, D_OUT = 900, 300, 100, 30
# Lane-dense padded hidden dims (multiples of 128 on the lane axis).
P_H1, P_H2 = 384, 128


def _mlp_kernel(x_ref, w1_ref, b1_ref, w2_ref, b2_ref, w3_ref, b3_ref, o_ref):
    """Fused 3-layer MLP: relu(relu(relu(x@W1+b1)@W2+b2)@W3+b3).

    x streams in as f32 and is cast to bf16 in-kernel; weights are bf16;
    accumulation, bias add and ReLU are f32 (MXU-native rate everywhere).
    """
    x = x_ref[...].astype(jnp.bfloat16)
    h1 = jnp.dot(x, w1_ref[...], preferred_element_type=jnp.float32) + b1_ref[...]
    h1 = jnp.maximum(h1, 0.0).astype(jnp.bfloat16)
    h2 = jnp.dot(h1, w2_ref[...], preferred_element_type=jnp.float32) + b2_ref[...]
    h2 = jnp.maximum(h2, 0.0).astype(jnp.bfloat16)
    h3 = jnp.dot(h2, w3_ref[...], preferred_element_type=jnp.float32) + b3_ref[...]
    o_ref[...] = jnp.maximum(h3, 0.0).astype(o_ref.dtype)


def _round_up(n, m):
    return ((n + m - 1) // m) * m


def _cdiv(a, b):
    return -(-a // b)


def _is_v7x():
    """Best-effort generation check (never raises)."""
    try:
        kind = jax.devices()[0].device_kind.lower()
    except Exception:
        return False
    return ("v7" in kind) or ("7x" in kind)


def _choose_tile(batch, requested, v7x):
    """Pick the batch tile.

    * Large batches: biggest tile <= requested, a multiple of 256 (keeps the
      256-wide MXU M-passes full on v6e/v7x and amortizes the ~0.35us/step
      pipeline overhead).  v7x caps the tile at 2048 to stay well under its
      64 MiB VMEM.
    * v7x only: for big batches, shrink the tile (never below 1024) until the
      grid has >= 8 steps, so the "parallel" axis gives each of the two
      TensorCores several pipelined steps.  v5e/v6e have one TensorCore, so
      the largest tile / fewest steps wins there -- no splitting.
    * Small batches: a single step covering the whole batch, rounded up to the
      8-sublane granule (the boundary block masks the ragged tail).
    """
    if v7x:
        requested = min(requested, 2048)
    requested = max(256, _round_up(requested, 256))
    if batch >= requested:
        tile = requested
        if v7x:
            while tile > 1024 and _cdiv(batch, tile) < 8:
                tile //= 2
        return tile
    return _round_up(batch, 8)


@functools.partial(jax.jit, static_argnames=("batch_tile",))
def local_model_kuhar_forward(x, padded_params, batch_tile=1024):
    """x: [B, 900] float32 -> [B, 30] float32 (fused Pallas MLP)."""
    w1, b1, w2, b2, w3, b3 = padded_params

    b = x.shape[0]
    v7x = _is_v7x()
    tile = _choose_tile(b, batch_tile, v7x)
    grid_steps = _cdiv(b, tile)

    # Advisory cost estimate so XLA schedules/overlaps the custom call well.
    rows = grid_steps * tile
    flops = 2 * rows * (D_IN * P_H1 + P_H1 * P_H2 + P_H2 * D_OUT)
    bytes_accessed = int(
        x.size * x.dtype.itemsize
        + sum(int(p.size) * p.dtype.itemsize for p in (w1, b1, w2, b2, w3, b3))
        + b * D_OUT * 4
    )

    # Weights/biases: constant index_map -> fetched once; single-buffered to
    # drop the unused second VMEM buffer (~0.9 MiB headroom, matters on v7x).
    def weight_spec(shape):
        return pl.BlockSpec(shape, lambda i: (0, 0), pipeline_mode=pl.Buffered(1))

    out = pl.pallas_call(
        _mlp_kernel,
        out_shape=jax.ShapeDtypeStruct((b, D_OUT), jnp.float32),
        grid_spec=pltpu.PrefetchScalarGridSpec(
            num_scalar_prefetch=0,
            grid=(grid_steps,),
            in_specs=[
                pl.BlockSpec((tile, D_IN), lambda i: (i, 0)),  # x tile (batch-tiled, f32)
                weight_spec((D_IN, P_H1)),                     # W1 (VMEM-resident, bf16)
                weight_spec((1, P_H1)),                        # b1 (f32)
                weight_spec((P_H1, P_H2)),                     # W2
                weight_spec((1, P_H2)),                        # b2
                weight_spec((P_H2, D_OUT)),                    # W3 (128 x 30)
                weight_spec((1, D_OUT)),                       # b3
            ],
            out_specs=pl.BlockSpec((tile, D_OUT), lambda i: (i, 0)),
        ),
        compiler_params=pltpu.CompilerParams(
            dimension_semantics=("parallel",),
            # 48 MiB on v7x (<= 64 MiB physical, headroom for compiler scratch);
            # 64 MiB on v5e/v6e (128 MiB physical, > v5e's 16 MiB scoped default).
            vmem_limit_bytes=(48 if v7x else 64) * 1024 * 1024,
        ),
        cost_estimate=pl.CostEstimate(
            flops=int(flops), transcendentals=0, bytes_accessed=bytes_accessed
        ),
    )(x, w1, b1, w2, b2, w3, b3)

    return out  # already [B, 30] float32 -- no post-slice pass


def init_params(key):
    """Deterministic init mimicking nn.Linear default (U(-1/sqrt(fan_in), +))."""
    ks = jax.random.split(key, 6)

    def lin(kw, kb, fan_in, fan_out):
        bound = 1.0 / jnp.sqrt(float(fan_in))
        w = jax.random.uniform(kw, (fan_in, fan_out), jnp.float32, -bound, bound)
        b = jax.random.uniform(kb, (fan_out,), jnp.float32, -bound, bound)
        return w, b

    w1, b1 = lin(ks[0], ks[1], D_IN, D_H1)
    w2, b2 = lin(ks[2], ks[3], D_H1, D_H2)
    w3, b3 = lin(ks[4], ks[5], D_H2, D_OUT)
    return (w1, b1, w2, b2, w3, b3)


def prepare_params(params):
    """One-time prep: zero-pad weights/biases to lane-dense hidden dims, cast W to bf16.

    Padded weight columns/rows and bias entries are exactly 0, so ReLU keeps all
    padded lanes at 0 and the forward numerics match the unpadded module.
    """
    w1, b1, w2, b2, w3, b3 = params

    def pad_w(w, rows, cols):
        return jnp.pad(w, ((0, rows - w.shape[0]), (0, cols - w.shape[1]))).astype(jnp.bfloat16)

    def pad_b(bias, cols):
        return jnp.pad(bias.reshape(1, -1), ((0, 0), (0, cols - bias.shape[-1]))).astype(jnp.float32)

    return (
        pad_w(w1, D_IN, P_H1), pad_b(b1, P_H1),
        pad_w(w2, P_H1, P_H2), pad_b(b2, P_H2),
        pad_w(w3, P_H2, D_OUT), pad_b(b3, D_OUT),
    )


def reference_forward_f32(x, params):
    """Pure f32 reference with the original module's semantics."""
    w1, b1, w2, b2, w3, b3 = params
    h = jnp.maximum(x @ w1 + b1, 0.0)
    h = jnp.maximum(h @ w2 + b2, 0.0)
    return jnp.maximum(h @ w3 + b3, 0.0)


def reference_forward_bf16(x, padded_params):
    """Reference matching the kernel's numerics (bf16 operands, f32 accumulation)."""
    w1, b1, w2, b2, w3, b3 = padded_params
    h = x.astype(jnp.bfloat16)
    h = jnp.maximum(jnp.dot(h, w1, preferred_element_type=jnp.float32) + b1, 0.0)
    h = h.astype(jnp.bfloat16)
    h = jnp.maximum(jnp.dot(h, w2, preferred_element_type=jnp.float32) + b2, 0.0)
    h = h.astype(jnp.bfloat16)
    h = jnp.maximum(jnp.dot(h, w3, preferred_element_type=jnp.float32) + b3, 0.0)
    return h  # already (B, 30)


if __name__ == "__main__":
    key = jax.random.PRNGKey(0)
    k_x, k_p = jax.random.split(key)

    batch = 4  # small demo batch (also exercises the ragged boundary block)
    x = jax.random.normal(k_x, (batch, D_IN), jnp.float32)
    params = init_params(k_p)
    padded_params = prepare_params(params)

    out = local_model_kuhar_forward(x, padded_params)
    out = jax.block_until_ready(out)
    assert out.shape == (batch, D_OUT), out.shape

    # Tight check vs a reference that mirrors the kernel's bf16/f32 numerics.
    ref_bf16 = reference_forward_bf16(x, padded_params)
    assert jnp.allclose(out, ref_bf16, atol=2e-3, rtol=2e-3), "mismatch vs bf16-matched reference"

    # Loose check vs the pure-f32 module semantics (bf16 operand rounding only).
    ref_f32 = reference_forward_f32(x, params)
    assert jnp.allclose(out, ref_f32, atol=5e-2, rtol=5e-2), "mismatch vs f32 reference"

    print("KERNEL_OK")
</pallas_src>

<mosaic_0001>
module attributes {stable_mosaic.version = 11 : i64} {
  func.func @_mlp_kernel(%arg0: i32, %arg1: memref<8x900xf32, #tpu.memory_space<vmem>>, %arg2: memref<900x384xbf16, #tpu.memory_space<vmem>>, %arg3: memref<1x384xf32, #tpu.memory_space<vmem>>, %arg4: memref<384x128xbf16, #tpu.memory_space<vmem>>, %arg5: memref<1x128xf32, #tpu.memory_space<vmem>>, %arg6: memref<128x30xbf16, #tpu.memory_space<vmem>>, %arg7: memref<1x30xf32, #tpu.memory_space<vmem>>, %arg8: memref<8x30xf32, #tpu.memory_space<vmem>>) attributes {dimension_semantics = [#tpu.dimension_semantics<parallel>], iteration_bounds = array<i64: 1>, scalar_prefetch = 0 : i64, scratch_operands = 0 : i64, tpu.core_type = #tpu.core_type<tc>, window_params = [{transform_indices = @transform_0, window_bounds = array<i64: 8, 900>}, {pipeline_mode = #tpu.pipeline_mode<synchronous>, transform_indices = @transform_1, window_bounds = array<i64: 900, 384>}, {pipeline_mode = #tpu.pipeline_mode<synchronous>, transform_indices = @transform_2, window_bounds = array<i64: 1, 384>}, {pipeline_mode = #tpu.pipeline_mode<synchronous>, transform_indices = @transform_3, window_bounds = array<i64: 384, 128>}, {pipeline_mode = #tpu.pipeline_mode<synchronous>, transform_indices = @transform_4, window_bounds = array<i64: 1, 128>}, {pipeline_mode = #tpu.pipeline_mode<synchronous>, transform_indices = @transform_5, window_bounds = array<i64: 128, 30>}, {pipeline_mode = #tpu.pipeline_mode<synchronous>, transform_indices = @transform_6, window_bounds = array<i64: 1, 30>}, {transform_indices = @transform_7, window_bounds = array<i64: 8, 30>}]} {
    %c0 = arith.constant 0 : index
    %c0_0 = arith.constant 0 : index
    %0 = vector.load %arg1[%c0, %c0_0] : memref<8x900xf32, #tpu.memory_space<vmem>>, vector<8x900xf32>
    %1 = arith.truncf %0 : vector<8x900xf32> to vector<8x900xbf16>
    %c0_1 = arith.constant 0 : index
    %c0_2 = arith.constant 0 : index
    %2 = vector.load %arg2[%c0_1, %c0_2] : memref<900x384xbf16, #tpu.memory_space<vmem>>, vector<900x384xbf16>
    %cst = arith.constant dense<0.000000e+00> : vector<8x384xf32>
    %3 = tpu.matmul %1, %2, %cst {dimension_numbers = #tpu.dot_dimension_numbers<[1], [0], [0], [1], [0, 0, 1, 1], [], []>} : vector<8x900xbf16>, vector<900x384xbf16>, vector<8x384xf32> -> vector<8x384xf32>
    %c0_3 = arith.constant 0 : index
    %c0_4 = arith.constant 0 : index
    %4 = vector.load %arg3[%c0_3, %c0_4] : memref<1x384xf32, #tpu.memory_space<vmem>>, vector<1x384xf32>
    %5 = vector.broadcast %4 : vector<1x384xf32> to vector<8x384xf32>
    %6 = arith.addf %3, %5 : vector<8x384xf32>
    %cst_5 = arith.constant 0.000000e+00 : f32
    %7 = vector.broadcast %cst_5 : f32 to vector<8x384xf32>
    %8 = arith.maximumf %6, %7 : vector<8x384xf32>
    %9 = arith.truncf %8 : vector<8x384xf32> to vector<8x384xbf16>
    %c0_6 = arith.constant 0 : index
    %c0_7 = arith.constant 0 : index
    %10 = vector.load %arg4[%c0_6, %c0_7] : memref<384x128xbf16, #tpu.memory_space<vmem>>, vector<384x128xbf16>
    %cst_8 = arith.constant dense<0.000000e+00> : vector<8x128xf32>
    %11 = tpu.matmul %9, %10, %cst_8 {dimension_numbers = #tpu.dot_dimension_numbers<[1], [0], [0], [1], [0, 0, 1, 1], [], []>} : vector<8x384xbf16>, vector<384x128xbf16>, vector<8x128xf32> -> vector<8x128xf32>
    %c0_9 = arith.constant 0 : index
    %c0_10 = arith.constant 0 : index
    %12 = vector.load %arg5[%c0_9, %c0_10] : memref<1x128xf32, #tpu.memory_space<vmem>>, vector<1x128xf32>
    %13 = vector.broadcast %12 : vector<1x128xf32> to vector<8x128xf32>
    %14 = arith.addf %11, %13 : vector<8x128xf32>
    %cst_11 = arith.constant 0.000000e+00 : f32
    %15 = vector.broadcast %cst_11 : f32 to vector<8x128xf32>
    %16 = arith.maximumf %14, %15 : vector<8x128xf32>
    %17 = arith.truncf %16 : vector<8x128xf32> to vector<8x128xbf16>
    %c0_12 = arith.constant 0 : index
    %c0_13 = arith.constant 0 : index
    %18 = vector.load %arg6[%c0_12, %c0_13] : memref<128x30xbf16, #tpu.memory_space<vmem>>, vector<128x30xbf16>
    %cst_14 = arith.constant dense<0.000000e+00> : vector<8x30xf32>
    %19 = tpu.matmul %17, %18, %cst_14 {dimension_numbers = #tpu.dot_dimension_numbers<[1], [0], [0], [1], [0, 0, 1, 1], [], []>} : vector<8x128xbf16>, vector<128x30xbf16>, vector<8x30xf32> -> vector<8x30xf32>
    %c0_15 = arith.constant 0 : index
    %c0_16 = arith.constant 0 : index
    %20 = vector.load %arg7[%c0_15, %c0_16] : memref<1x30xf32, #tpu.memory_space<vmem>>, vector<1x30xf32>
    %21 = vector.broadcast %20 : vector<1x30xf32> to vector<8x30xf32>
    %22 = arith.addf %19, %21 : vector<8x30xf32>
    %cst_17 = arith.constant 0.000000e+00 : f32
    %23 = vector.broadcast %cst_17 : f32 to vector<8x30xf32>
    %24 = arith.maximumf %22, %23 : vector<8x30xf32>
    %c0_18 = arith.constant 0 : index
    %c0_19 = arith.constant 0 : index
    %25 = vector.load %arg8[%c0_18, %c0_19] : memref<8x30xf32, #tpu.memory_space<vmem>>, vector<8x30xf32>
    tpu.vector_store %arg8[%c0_18, %c0_19], %24 {strides = array<i32>} : memref<8x30xf32, #tpu.memory_space<vmem>>, vector<8x30xf32>,
    return
  }
  func.func @transform_0(%arg0: i32) -> (i32, i32) {
    %c0_i32 = arith.constant 0 : i32
    %c0_i32_0 = arith.constant 0 : i32
    return %arg0, %c0_i32 : i32, i32
  }
  func.func @transform_1(%arg0: i32) -> (i32, i32) {
    %c0_i32 = arith.constant 0 : i32
    %c0_i32_0 = arith.constant 0 : i32
    %c0_i32_1 = arith.constant 0 : i32
    return %c0_i32, %c0_i32_0 : i32, i32
  }
  func.func @transform_2(%arg0: i32) -> (i32, i32) {
    %c0_i32 = arith.constant 0 : i32
    %c0_i32_0 = arith.constant 0 : i32
    %c0_i32_1 = arith.constant 0 : i32
    return %c0_i32, %c0_i32_0 : i32, i32
  }
  func.func @transform_3(%arg0: i32) -> (i32, i32) {
    %c0_i32 = arith.constant 0 : i32
    %c0_i32_0 = arith.constant 0 : i32
    %c0_i32_1 = arith.constant 0 : i32
    return %c0_i32, %c0_i32_0 : i32, i32
  }
  func.func @transform_4(%arg0: i32) -> (i32, i32) {
    %c0_i32 = arith.constant 0 : i32
    %c0_i32_0 = arith.constant 0 : i32
    %c0_i32_1 = arith.constant 0 : i32
    return %c0_i32, %c0_i32_0 : i32, i32
  }
  func.func @transform_5(%arg0: i32) -> (i32, i32) {
    %c0_i32 = arith.constant 0 : i32
    %c0_i32_0 = arith.constant 0 : i32
    %c0_i32_1 = arith.constant 0 : i32
    return %c0_i32, %c0_i32_0 : i32, i32
  }
  func.func @transform_6(%arg0: i32) -> (i32, i32) {
    %c0_i32 = arith.constant 0 : i32
    %c0_i32_0 = arith.constant 0 : i32
    %c0_i32_1 = arith.constant 0 : i32
    return %c0_i32, %c0_i32_0 : i32, i32
  }
  func.func @transform_7(%arg0: i32) -> (i32, i32) {
    %c0_i32 = arith.constant 0 : i32
    %c0_i32_0 = arith.constant 0 : i32
    return %arg0, %c0_i32 : i32, i32
  }
}

</mosaic_0001>

<bundles_post_ra>
// kernel: local_model_kuhar_forward.1
= control target key start
LH: loop header
LB: loop body
LE: loop exit
PB: predicated region body
PF: predicated region fallthrough
CT: control target
= control target key end

     0   :  { %12 = vsyncpa [#allocation3], 0  ;;  %s2887_s0 = inlined_call_operand.vmem [shape: f32[4,900], index: 0, kind: input, shape index: {}]   ;;  %s2888_s1 = inlined_call_operand.hbm [shape: bf16[900,384], index: 1, kind: input, shape index: {}]   ;;  %s2889_s2 = inlined_call_operand.vmem [shape: f32[1,384], index: 2, kind: input, shape index: {}]   ;;  %s2890_s3 = inlined_call_operand.hbm [shape: bf16[384,128], index: 3, kind: input, shape index: {}]   ;;  %s2891_s4 = inlined_call_operand.vmem [shape: f32[1,128], index: 4, kind: input, shape index: {}]   ;;  %s2892_s5 = inlined_call_operand.vmem [shape: bf16[128,30], index: 5, kind: input, shape index: {}]   ;;  %s2893_s6 = inlined_call_operand.vmem [shape: f32[1,30], index: 6, kind: input, shape index: {}]   ;;  %s2894_s7 = inlined_call_operand.hbm [shape: f32[4,30], index: 7, kind: output, shape index: {}]  }
   0x1   :  { %13 = vsyncpa [#allocation6], 0 }
   0x2   :  { %14 = vsyncpa [#allocation4], 0  ;;  %s2689_s24 = smov [#allocation2]  }
   0x3   :  { %s22_s25 = sshll.u32 %s2689_s24, 4  ;;  %s23_s25 = int_to_ptr.vmem [resolvable:$true] %s22_s25 }
   0x4   :  { %s2631_s26 = scalar_lea.vmem %s23_s25, 21696  ;;  %p2636_p1 = scmp.lt.s32.totalorder %s23_s25, %s23_s25 }
   0x5   :  { %p2632_p0 = scmp.ne.s32.totalorder %s23_s25, %s2631_s26  ;;  %p2637_p2 = scmp.lt.s32.totalorder %s2631_s26, %s2631_s26 }
   0x7   :  { %p2638_p3 = por %p2637_p2, %p2636_p1 }
   0x9   :  { %p2639_p4 = pnand %p2638_p3, %p2632_p0 }
   0xb   :  { %2642 = shalt.err (!%p2639_p4)
}
   0xc   :  { %s2690_s27 = smov 192   ;;  %s2691_s28 = smov 12  }
   0xd   :  { %28 = dma.hbm_to_vmem [thread:$0]  %s2888_s1, 21696, %s23_s25, [#allocation3], %s2690_s27, %s2690_s27, %s2691_s28  }
   0xe   :  { %s2692_s8 = smov [#allocation5]  }
   0xf   :  { %s36_s9 = sshll.u32 %s2692_s8, 4  ;;  %s37_s9 = int_to_ptr.vmem [resolvable:$true] %s36_s9 }
  0x10   :  { %s2651_s10 = scalar_lea.vmem %s37_s9, 3072  ;;  %p2656_p6 = scmp.lt.s32.totalorder %s37_s9, %s37_s9 }
  0x11   :  { %p2652_p5 = scmp.ne.s32.totalorder %s37_s9, %s2651_s10  ;;  %p2657_p7 = scmp.lt.s32.totalorder %s2651_s10, %s2651_s10 }
  0x13   :  { %p2658_p8 = por %p2657_p7, %p2656_p6 }
  0x15   :  { %p2659_p9 = pnand %p2658_p8, %p2652_p5 }
  0x17   :  { %2662 = shalt.err (!%p2659_p9)
}
  0x18   :  { %s2693_s11 = smov 64   ;;  %s2694_s12 = smov 4  }
  0x19   :  { %42 = dma.hbm_to_vmem [thread:$0]  %s2890_s3, 3072, %s37_s9, [#allocation6], %s2693_s11, %s2693_s11, %s2694_s12  }
  0x1a   :  { %2683 = dma.done.wait [#allocation3], 21696  }
  0x1b   :  { %2684 = vsyncadd [#allocation3], 4294945600 }
  0x1c   :  { %2685 = dma.done.wait [#allocation6], 3072  }
  0x1d   :  { %2686 = vsyncadd [#allocation6], 4294964224  ;;  %v2364_v0 = vld [vmem:[#allocation2 + $0xac] ss:$12 sps:$4 sm:$0xff]   ;;  %v2368_v2 = vld [vmem:[#allocation2 + $0xa8] ss:$12 sps:$4 sm:$0xff]  }
  0x1e   :  { %v2366_v1 = vld [vmem:[#allocation2 + $0x22c] ss:$12 sps:$4 sm:$0xff]   ;;  %1257 = vmatprep.subr.bf16.mxu0 %v2364_v0  ;;  %v2369_v3 = vld [vmem:[#allocation2 + $0x228] ss:$12 sps:$4 sm:$0xff]   ;;  %v2374_v6 = vld [vmem:[#allocation2 + $0x90] ss:$12 sps:$4 sm:$0xff]  }
  0x1f   :  { %1298 = vmatprep.subr.bf16.mxu1 %v2366_v1  ;;  %v2370_v4 = vld [vmem:[#allocation2 + $0x94] ss:$12 sps:$4 sm:$0xff]   ;;  %1258 = vmatpush1.bf16.msra.mxu0 %v2368_v2  ;;  %v2375_v7 = vld [vmem:[#allocation2 + $0x210] ss:$12 sps:$4 sm:$0xff]   ;;  %v2380_v10 = vld [vmem:[#allocation2 + $0x78] ss:$12 sps:$4 sm:$0xff]  }
  0x20   :  { %1299 = vmatpush1.bf16.msra.mxu1 %v2369_v3  ;;  %v2372_v5 = vld [vmem:[#allocation2 + $0x214] ss:$12 sps:$4 sm:$0xff]   ;;  %1259 = vmatprep.subr.bf16.mxu0 %v2370_v4  ;;  %v2376_v8 = vld [vmem:[#allocation2 + $0x7c] ss:$12 sps:$4 sm:$0xff]   ;;  %v2381_v11 = vld [vmem:[#allocation2 + $0x1f8] ss:$12 sps:$4 sm:$0xff]  }
  0x21   :  { %1300 = vmatprep.subr.bf16.mxu1 %v2372_v5  ;;  %v2378_v9 = vld [vmem:[#allocation2 + $0x1fc] ss:$12 sps:$4 sm:$0xff]   ;;  %v2382_v12 = vld [vmem:[#allocation2 + $0x64] ss:$12 sps:$4 sm:$0xff]   ;;  %v2386_v14 = vld [vmem:[#allocation2 + $0x60] ss:$12 sps:$4 sm:$0xff]  }
  0x22   :  { %v2384_v13 = vld [vmem:[#allocation2 + $0x1e4] ss:$12 sps:$4 sm:$0xff]   ;;  %v2387_v15 = vld [vmem:[#allocation2 + $0x1e0] ss:$12 sps:$4 sm:$0xff]   ;;  %v2392_v18 = vld [vmem:[#allocation2 + $0x48] ss:$12 sps:$4 sm:$0xff]  }
  0x23   :  { %1260 = vmatpush1.bf16.msra.mxu0 %v2374_v6  ;;  %v2388_v16 = vld [vmem:[#allocation2 + $0x4c] ss:$12 sps:$4 sm:$0xff]   ;;  %v2393_v19 = vld [vmem:[#allocation2 + $0x1c8] ss:$12 sps:$4 sm:$0xff]   ;;  %v2398_v22 = vld [vmem:[#allocation2 + $0x30] ss:$12 sps:$4 sm:$0xff]  }
  0x24   :  { %1301 = vmatpush1.bf16.msra.mxu1 %v2375_v7  ;;  %1261 = vmatprep.subr.bf16.mxu0 %v2376_v8  ;;  %v2390_v17 = vld [vmem:[#allocation2 + $0x1cc] ss:$12 sps:$4 sm:$0xff]   ;;  %v2394_v20 = vld [vmem:[#allocation2 + $0x34] ss:$12 sps:$4 sm:$0xff]   ;;  %v2399_v23 = vld [vmem:[#allocation2 + $0x1b0] ss:$12 sps:$4 sm:$0xff]  }
  0x25   :  { %1302 = vmatprep.subr.bf16.mxu1 %v2378_v9  ;;  %v2396_v21 = vld [vmem:[#allocation2 + $0x1b4] ss:$12 sps:$4 sm:$0xff]   ;;  %v2400_v24 = vld [vmem:[#allocation2 + $0x1c] ss:$12 sps:$4 sm:$0xff]   ;;  %v2404_v26 = vld [vmem:[#allocation2 + $0x18] ss:$12 sps:$4 sm:$0xff]  }
  0x26   :  { %v2402_v25 = vld [vmem:[#allocation2 + $0x19c] ss:$12 sps:$4 sm:$0xff]   ;;  %v2405_v27 = vld [vmem:[#allocation2 + $0x198] ss:$12 sps:$4 sm:$0xff]   ;;  %v2410_v30 = vld [vmem:[#allocation2] ss:$12 sps:$4 sm:$0xff]  }
  0x27   :  { %1262 = vmatpush1.bf16.msra.mxu0 %v2380_v10  ;;  %v2406_v28 = vld [vmem:[#allocation2 + $0x4] ss:$12 sps:$4 sm:$0xff]   ;;  %v2411_v31 = vld [vmem:[#allocation2 + $0x180] ss:$12 sps:$4 sm:$0xff]   ;;  %v2416_v34 = vld [vmem:[#allocation2 + $0x168] ss:$12 sps:$4 sm:$0xff]  }
  0x28   :  { %1303 = vmatpush1.bf16.msra.mxu1 %v2381_v11  ;;  %1263 = vmatprep.subr.bf16.mxu0 %v2382_v12  ;;  %v2408_v29 = vld [vmem:[#allocation2 + $0x184] ss:$12 sps:$4 sm:$0xff]   ;;  %v2412_v32 = vld [vmem:[#allocation2 + $0x16c] ss:$12 sps:$4 sm:$0xff]   ;;  %v2417_v35 = vld [vmem:[#allocation2 + $0x2e8] ss:$12 sps:$4 sm:$0xff]  }
  0x29   :  { %1304 = vmatprep.subr.bf16.mxu1 %v2384_v13  ;;  %v2414_v33 = vld [vmem:[#allocation2 + $0x2ec] ss:$12 sps:$4 sm:$0xff]   ;;  %v2418_v36 = vld [vmem:[#allocation2 + $0x154] ss:$12 sps:$4 sm:$0xff]   ;;  %v2422_v38 = vld [vmem:[#allocation2 + $0x150] ss:$12 sps:$4 sm:$0xff]  }
  0x2a   :  { %v2420_v37 = vld [vmem:[#allocation2 + $0x2d4] ss:$12 sps:$4 sm:$0xff]   ;;  %v2423_v39 = vld [vmem:[#allocation2 + $0x2d0] ss:$12 sps:$4 sm:$0xff]   ;;  %v2428_v42 = vld [vmem:[#allocation2 + $0x138] ss:$12 sps:$4 sm:$0xff]  }
  0x2b   :  { %1264 = vmatpush1.bf16.msra.mxu0 %v2386_v14  ;;  %v2424_v40 = vld [vmem:[#allocation2 + $0x13c] ss:$12 sps:$4 sm:$0xff]   ;;  %v2429_v43 = vld [vmem:[#allocation2 + $0x2b8] ss:$12 sps:$4 sm:$0xff]   ;;  %v2434_v46 = vld [vmem:[#allocation2 + $0x120] ss:$12 sps:$4 sm:$0xff]  }
  0x2c   :  { %1305 = vmatpush1.bf16.msra.mxu1 %v2387_v15  ;;  %1265 = vmatprep.subr.bf16.mxu0 %v2388_v16  ;;  %v2426_v41 = vld [vmem:[#allocation2 + $0x2bc] ss:$12 sps:$4 sm:$0xff]   ;;  %v2430_v44 = vld [vmem:[#allocation2 + $0x124] ss:$12 sps:$4 sm:$0xff]   ;;  %v2435_v47 = vld [vmem:[#allocation2 + $0x2a0] ss:$12 sps:$4 sm:$0xff]  }
  0x2d   :  { %1306 = vmatprep.subr.bf16.mxu1 %v2390_v17  ;;  %v2432_v45 = vld [vmem:[#allocation2 + $0x2a4] ss:$12 sps:$4 sm:$0xff]   ;;  %v57_v50 = vld [vmem:[%s2887_s0 + $0x8] sm:$0xff]  ;;  %v2442_v60 = vld [vmem:[#allocation2 + $0xf4] ss:$12 sps:$4 sm:$0xff]   ;;  %vm1243_vm0 = vcmask 31744  }
  0x2e   :  { %v56_v48 = vld [vmem:[%s2887_s0] sm:$0xff]  ;;  %v61_v51 = vld [vmem:[%s2887_s0 + $0x28] sm:$0xff]  ;;  %v2446_v62 = vld [vmem:[#allocation2 + $0xf0] ss:$12 sps:$4 sm:$0xff]   ;;  %vm1247_vm1 = vcmask 1041408   ;;  %vm2697_vm2 = vmmov 0  }
  0x2f   :  { %1266 = vmatpush1.bf16.msra.mxu0 %v2392_v18  ;;  %v60_v49 = vld [vmem:[%s2887_s0 + $0x20] sm:$0xff]  ;;  %v2436_v52 = vld [vmem:[#allocation2 + $0x10c] ss:$12 sps:$4 sm:$0xff]   ;;  %v75_v55 = vcombine.high %v57_v50, %v61_v51  ;;  %v2440_v57 = vld [vmem:[#allocation2 + $0x108] ss:$12 sps:$4 sm:$0xff]   ;;  %v74_v9 = vcombine.low %v57_v50, %v61_v51  ;;  %vm1980_vm3 = vcmask 244736  }
  0x30   :  { %1307 = vmatpush1.bf16.msra.mxu1 %v2393_v19  ;;  %1267 = vmatprep.subr.bf16.mxu0 %v2394_v20  ;;  %v73_v53 = vcombine.high %v56_v48, %v60_v49  ;;  %v2438_v54 = vld [vmem:[#allocation2 + $0x28c] ss:$12 sps:$4 sm:$0xff]   ;;  %v2441_v58 = vld [vmem:[#allocation2 + $0x288] ss:$12 sps:$4 sm:$0xff]   ;;  %v2447_v63 = vld [vmem:[#allocation2 + $0x270] ss:$12 sps:$4 sm:$0xff]   ;;  %v72_v8 = vcombine.low %v56_v48, %v60_v49 }
  0x31   :  { %1308 = vmatprep.subr.bf16.mxu1 %v2396_v21  ;;  %v2762_v59 = vpack.c.bf16 %v75_v55, %v75_v55  ;;  %v2444_v61 = vld [vmem:[#allocation2 + $0x274] ss:$12 sps:$4 sm:$0xff]   ;;  %v2448_v0 = vld [vmem:[#allocation2 + $0xdc] ss:$12 sps:$4 sm:$0xff]   ;;  %v2452_v2 = vld [vmem:[#allocation2 + $0xd8] ss:$12 sps:$4 sm:$0xff]   ;;  %v2768_v15 = vpack.c.bf16 %v74_v9, %v74_v9 }
  0x32   :  { %v2760_v56 = vpack.c.bf16 %v73_v53, %v73_v53  ;;  %v2450_v1 = vld [vmem:[#allocation2 + $0x25c] ss:$12 sps:$4 sm:$0xff]   ;;  %v2453_v3 = vld [vmem:[#allocation2 + $0x258] ss:$12 sps:$4 sm:$0xff]   ;;  %v2458_v6 = vld [vmem:[#allocation2 + $0xc0] ss:$12 sps:$4 sm:$0xff]   ;;  %v2766_v12 = vpack.c.bf16 %v72_v8, %v72_v8 }
  0x33   :  { %1268 = vmatpush1.bf16.msra.mxu0 %v2398_v22  ;;  %1330 = vmatprep.mubr.bf16.mxu1 %v2762_v59  ;;  %v2454_v4 = vld [vmem:[#allocation2 + $0xc4] ss:$12 sps:$4 sm:$0xff]   ;;  %v2459_v7 = vld [vmem:[#allocation2 + $0x240] ss:$12 sps:$4 sm:$0xff]   ;;  %v2460_v13 = vld [vmem:[#allocation2 + $0x3a8] ss:$12 sps:$4 sm:$0xff]  }
  0x34   :  { %1309 = vmatpush1.bf16.msra.mxu1 %v2399_v23  ;;  %1269 = vmatprep.subr.bf16.mxu0 %v2400_v24  ;;  %v2456_v5 = vld [vmem:[#allocation2 + $0x244] ss:$12 sps:$4 sm:$0xff]   ;;  %v2462_v10 = vld [vmem:[#allocation2 + $0x3ac] ss:$12 sps:$4 sm:$0xff]   ;;  %v2463_v14 = vld [vmem:[#allocation2 + $0x528] ss:$12 sps:$4 sm:$0xff]  }
  0x35   :  { %1310 = vmatprep.subr.bf16.mxu1 %v2402_v25  ;;  %1289 = vmatprep.mubr.bf16.mxu0 %v2760_v56  ;;  %v2465_v11 = vld [vmem:[#allocation2 + $0x52c] ss:$12 sps:$4 sm:$0xff]   ;;  %v2468_v16 = vld [vmem:[#allocation2 + $0x394] ss:$12 sps:$4 sm:$0xff]   ;;  %v2466_v18 = vld [vmem:[#allocation2 + $0x390] ss:$12 sps:$4 sm:$0xff]  }
  0x36   :  { %v2471_v17 = vld [vmem:[#allocation2 + $0x514] ss:$12 sps:$4 sm:$0xff]   ;;  %v2469_v19 = vld [vmem:[#allocation2 + $0x510] ss:$12 sps:$4 sm:$0xff]   ;;  %v2472_v25 = vld [vmem:[#allocation2 + $0x378] ss:$12 sps:$4 sm:$0xff]  }
  0x37   :  { %1270 = vmatpush1.bf16.msra.mxu0 %v2404_v26  ;;  %v2474_v20 = vld [vmem:[#allocation2 + $0x37c] ss:$12 sps:$4 sm:$0xff]   ;;  %v2475_v26 = vld [vmem:[#allocation2 + $0x4f8] ss:$12 sps:$4 sm:$0xff]   ;;  %v2791_v48 = vld [vmem:[%s2887_s0 + $0x10] sm:$0xff] }
  0x38   :  { %1311 = vmatpush1.bf16.msra.mxu1 %v2405_v27  ;;  %1271 = vmatprep.subr.bf16.mxu0 %v2406_v28  ;;  %v2477_v21 = vld [vmem:[#allocation2 + $0x4fc] ss:$12 sps:$4 sm:$0xff]   ;;  %v2480_v28 = vld [vmem:[#allocation2 + $0x364] ss:$12 sps:$4 sm:$0xff]   ;;  %v2505_v50 = vld [vmem:[#allocation2 + $0x480] ss:$12 sps:$4 sm:$0xff]  }
  0x39   :  { %1312 = vmatprep.subr.bf16.mxu1 %v2408_v29  ;;  %v2775_v22 = vld [vmem:[%s2887_s0 + $0x18] sm:$0xff]  ;;  %v2483_v29 = vld [vmem:[#allocation2 + $0x4e4] ss:$12 sps:$4 sm:$0xff]   ;;  %v2508_v55 = vld [vmem:[#allocation2 + $0x468] ss:$12 sps:$4 sm:$0xff]  }
  0x3a   :  { %v2780_v23 = vld [vmem:[%s2887_s0 + $0x38] sm:$0xff]  ;;  %v2796_v49 = vld [vmem:[%s2887_s0 + $0x30] sm:$0xff]  ;;  %v2523_v8 = vld [vmem:[#allocation2 + $0x420] ss:$12 sps:$4 sm:$0xff]  }
  0x3b   :  { %1272 = vmatpush1.bf16.msra.mxu0 %v2410_v30  ;;  %v79_v24 = vcombine.high %v2775_v22, %v2780_v23  ;;  %v2478_v30 = vld [vmem:[#allocation2 + $0x360] ss:$12 sps:$4 sm:$0xff]  }
  0x3c   :  { %1313 = vmatpush1.bf16.msra.mxu1 %v2411_v31  ;;  %1273 = vmatprep.subr.bf16.mxu0 %v2412_v32  ;;  %v2481_v31 = vld [vmem:[#allocation2 + $0x4e0] ss:$12 sps:$4 sm:$0xff]  }
  0x3d   :  { %1314 = vmatprep.subr.bf16.mxu1 %v2414_v33  ;;  %v2784_v27 = vpack.c.bf16 %v79_v24, %v79_v24  ;;  %v2486_v32 = vld [vmem:[#allocation2 + $0x34c] ss:$12 sps:$4 sm:$0xff]  }
  0x3e   :  { %v2489_v33 = vld [vmem:[#allocation2 + $0x4cc] ss:$12 sps:$4 sm:$0xff]  }
  0x3f   :  { %1274 = vmatpush2.bf16.msra.mxu0 %v2416_v34  ;;  %v2484_v34 = vld [vmem:[#allocation2 + $0x348] ss:$12 sps:$4 sm:$0xff]   ;;  %v2510_v53 = vld [vmem:[#allocation2 + $0x46c] ss:$12 sps:$4 sm:$0xff]  }
  0x40   :  { %1315 = vmatpush2.bf16.msra.mxu1 %v2417_v35  ;;  %1275 = vmatprep.subr.bf16.mxu0 %v2418_v36  ;;  %v2487_v35 = vld [vmem:[#allocation2 + $0x4c8] ss:$12 sps:$4 sm:$0xff]   ;;  %v2527_v9 = vld [vmem:[#allocation2 + $0x80] ss:$12 sps:$4 sm:$0xff]  }
  0x41   :  { %1316 = vmatprep.subr.bf16.mxu1 %v2420_v37  ;;  %v2492_v36 = vld [vmem:[#allocation2 + $0x334] ss:$12 sps:$4 sm:$0xff]  }
  0x42   :  { %v2495_v37 = vld [vmem:[#allocation2 + $0x4b4] ss:$12 sps:$4 sm:$0xff]  }
  0x43   :  { %1276 = vmatpush2.bf16.msra.mxu0 %v2422_v38  ;;  %v2490_v38 = vld [vmem:[#allocation2 + $0x330] ss:$12 sps:$4 sm:$0xff]   ;;  %v2546_v24 = vld [vmem:[#allocation2 + $0xe0] ss:$12 sps:$4 sm:$0xff]  }
  0x44   :  { %1317 = vmatpush2.bf16.msra.mxu1 %v2423_v39  ;;  %1277 = vmatprep.subr.bf16.mxu0 %v2424_v40  ;;  %v2493_v39 = vld [vmem:[#allocation2 + $0x4b0] ss:$12 sps:$4 sm:$0xff]  }
  0x45   :  { %1318 = vmatprep.subr.bf16.mxu1 %v2426_v41  ;;  %v2498_v40 = vld [vmem:[#allocation2 + $0x31c] ss:$12 sps:$4 sm:$0xff]  }
  0x46   :  { %v2501_v41 = vld [vmem:[#allocation2 + $0x49c] ss:$12 sps:$4 sm:$0xff]  }
  0x47   :  { %1278 = vmatpush2.bf16.msra.mxu0 %v2428_v42  ;;  %v2496_v42 = vld [vmem:[#allocation2 + $0x318] ss:$12 sps:$4 sm:$0xff]  }
  0x48   :  { %1319 = vmatpush2.bf16.msra.mxu1 %v2429_v43  ;;  %1279 = vmatprep.subr.bf16.mxu0 %v2430_v44  ;;  %v2499_v43 = vld [vmem:[#allocation2 + $0x498] ss:$12 sps:$4 sm:$0xff]  }
  0x49   :  { %1320 = vmatprep.subr.bf16.mxu1 %v2432_v45  ;;  %v2504_v44 = vld [vmem:[#allocation2 + $0x304] ss:$12 sps:$4 sm:$0xff]  }
  0x4a   :  { %v2507_v45 = vld [vmem:[#allocation2 + $0x484] ss:$12 sps:$4 sm:$0xff]  }
  0x4b   :  { %1280 = vmatpush2.bf16.msra.mxu0 %v2434_v46  ;;  %v320_v46 = vld [vmem:[#allocation2 + $0x540] sm:$0x33] }
  0x4c   :  { %1321 = vmatpush2.bf16.msra.mxu1 %v2435_v47  ;;  %1281 = vmatprep.subr.bf16.mxu0 %v2436_v52  ;;  %v2502_v47 = vld [vmem:[#allocation2 + $0x300] ss:$12 sps:$4 sm:$0xff]   ;;  %v2168_v51 = vcombine.low %v320_v46, %v320_v46  ;;  %v77_v52 = vcombine.high %v2791_v48, %v2796_v49 }
  0x4d   :  { %1322 = vmatprep.subr.bf16.mxu1 %v2438_v54  ;;  %v2169_v54 = vcombine.high %v320_v46, %v320_v46  ;;  %v2564_v46 = vld [vmem:[#allocation2 + $0x290] ss:$12 sps:$4 sm:$0xff]  }
  0x4f   :  { %1282 = vmatpush2.bf16.msra.mxu0 %v2440_v57  ;;  %v2800_v57 = vpack.c.bf16 %v77_v52, %v77_v52  ;;  %v2572_v52 = vld [vmem:[#allocation2 + $0x260] ss:$12 sps:$4 sm:$0xff]  }
  0x50   :  { %1323 = vmatpush2.bf16.msra.mxu1 %v2441_v58  ;;  %1283 = vmatprep.subr.bf16.mxu0 %v2442_v60  ;;  %v2515_v58 = vld [vmem:[#allocation2 + $0x454] ss:$12 sps:$4 sm:$0xff]   ;;  %v78_v60 = vcombine.low %v2775_v22, %v2780_v23  ;;  %v2542_v22 = vld [vmem:[#allocation2 + $0x38] ss:$12 sps:$4 sm:$0xff]  }
  0x51   :  { %1324 = vmatprep.subr.bf16.mxu1 %v2444_v61  ;;  %v1249_v61 = vsel %vm1247_vm1, %v2168_v51, 0  ;;  %v2545_v23 = vld [vmem:[#allocation2 + $0x3c4] ss:$12 sps:$4 sm:$0xff]  }
  0x52   :  { %v2571_v51 = vld [vmem:[#allocation2 + $0x350] ss:$12 sps:$4 sm:$0xff]  }
  0x53   :  { %1284 = vmatpush2.bf16.msra.mxu0 %v2446_v62  ;;  %v2516_v62 = vld [vmem:[#allocation2 + $0x170] ss:$12 sps:$4 sm:$0xff]  }
  0x54   :  { %1325 = vmatpush2.bf16.msra.mxu1 %v2447_v63  ;;  %1285 = vmatprep.subr.bf16.mxu0 %v2448_v0  ;;  %v2513_v63 = vld [vmem:[#allocation2 + $0x450] ss:$12 sps:$4 sm:$0xff]   ;;  %v2807_v0 = vpack.c.bf16 %v78_v60, %v78_v60  ;;  %v2578_v60 = vld [vmem:[#allocation2 + $0x188] ss:$12 sps:$4 sm:$0xff]  }
  0x55   :  { %1326 = vmatprep.subr.bf16.mxu1 %v2450_v1  ;;  %v2517_v1 = vld [vmem:[#allocation2 + $0xb0] ss:$12 sps:$4 sm:$0xff]  }
  0x57   :  { %1286 = vmatpush2.bf16.msra.mxu0 %v2452_v2  ;;  %v2520_v2 = vld [vmem:[#allocation2 + $0x43c] ss:$12 sps:$4 sm:$0xff]  }
  0x58   :  { %1327 = vmatpush2.bf16.msra.mxu1 %v2453_v3  ;;  %1287 = vmatprep.subr.bf16.mxu0 %v2454_v4  ;;  %v2521_v3 = vld [vmem:[#allocation2 + $0x158] ss:$12 sps:$4 sm:$0xff]  }
  0x59   :  { %1328 = vmatprep.subr.bf16.mxu1 %v2456_v5  ;;  %v2518_v4 = vld [vmem:[#allocation2 + $0x438] ss:$12 sps:$4 sm:$0xff]  }
  0x5a   :  { %v2522_v5 = vld [vmem:[#allocation2 + $0x98] ss:$12 sps:$4 sm:$0xff]  }
  0x5b   :  { %1288 = vmatpush2.bf16.msra.mxu0 %v2458_v6  ;;  %v2525_v6 = vld [vmem:[#allocation2 + $0x424] ss:$12 sps:$4 sm:$0xff]  }
  0x5c   :  { %1329 = vmatpush2.bf16.msra.mxu1 %v2459_v7  ;;  %1339 = vmatprep.subr.bf16.mxu0 %v2462_v10  ;;  %v2526_v7 = vld [vmem:[#allocation2 + $0x140] ss:$12 sps:$4 sm:$0xff]  }
  0x5d   :  { %1380 = vmatprep.subr.bf16.mxu1 %v2465_v11  ;;  %v2530_v10 = vld [vmem:[#allocation2 + $0x40c] ss:$12 sps:$4 sm:$0xff]   ;;  %v2531_v11 = vld [vmem:[#allocation2 + $0x128] ss:$12 sps:$4 sm:$0xff]  }
  0x5e   :  { %1290 = vmatmul.mubr.bf16.vlgmr.msra.gmra.mxu0 %v2766_v12 }
  0x5f   :  { %1331 = vmatmul.mubr.bf16.vlgmr.msra.gmra.mxu1 %v2768_v15  ;;  %1340 = vmatpush1.bf16.msra.mxu0 %v2460_v13  ;;  %v2528_v13 = vld [vmem:[#allocation2 + $0x408] ss:$12 sps:$4 sm:$0xff]  }
  0x60   :  { %1381 = vmatpush1.bf16.msra.mxu1 %v2463_v14  ;;  %1341 = vmatprep.subr.bf16.mxu0 %v2468_v16  ;;  %v2532_v14 = vld [vmem:[#allocation2 + $0x68] ss:$12 sps:$4 sm:$0xff]  }
  0x61   :  { %1382 = vmatprep.subr.bf16.mxu1 %v2471_v17  ;;  %2172 = vmatprep.mubr.msk.bf16.mxu1 %vm1243_vm0, %v2784_v27  ;;  %v2535_v16 = vld [vmem:[#allocation2 + $0x3f4] ss:$12 sps:$4 sm:$0xff]   ;;  %v2536_v17 = vld [vmem:[#allocation2 + $0x110] ss:$12 sps:$4 sm:$0xff]  }
  0x62   :  { %1371 = vmatprep.mubr.bf16.mxu0 %v2800_v57 }
  0x63   :  { %1342 = vmatpush1.bf16.msra.mxu0 %v2466_v18  ;;  %v2533_v18 = vld [vmem:[#allocation2 + $0x3f0] ss:$12 sps:$4 sm:$0xff]  }
  0x64   :  { %1383 = vmatpush1.bf16.msra.mxu1 %v2469_v19  ;;  %1343 = vmatprep.subr.bf16.mxu0 %v2474_v20  ;;  %v2537_v19 = vld [vmem:[#allocation2 + $0x50] ss:$12 sps:$4 sm:$0xff]   ;;  %v2541_v20 = vld [vmem:[#allocation2 + $0xf8] ss:$12 sps:$4 sm:$0xff]  }
  0x65   :  { %1384 = vmatprep.subr.bf16.mxu1 %v2477_v21  ;;  %v2538_v21 = vld [vmem:[#allocation2 + $0x3d8] ss:$12 sps:$4 sm:$0xff]  }
  0x67   :  { %1344 = vmatpush1.bf16.msra.mxu0 %v2472_v25  ;;  %v2543_v25 = vld [vmem:[#allocation2 + $0x3c0] ss:$12 sps:$4 sm:$0xff]  }
  0x68   :  { %1385 = vmatpush1.bf16.msra.mxu1 %v2475_v26  ;;  %1345 = vmatprep.subr.bf16.mxu0 %v2480_v28  ;;  %v2547_v26 = vld [vmem:[#allocation2 + $0x20] ss:$12 sps:$4 sm:$0xff]   ;;  %v76_v28 = vcombine.low %v2791_v48, %v2796_v49  ;;  %v2567_v48 = vld [vmem:[#allocation2 + $0x368] ss:$12 sps:$4 sm:$0xff]   ;;  %v2569_v49 = vld [vmem:[#allocation2 + $0x410] ss:$12 sps:$4 sm:$0xff]  }
  0x69   :  { %1386 = vmatprep.subr.bf16.mxu1 %v2483_v29  ;;  %v2548_v29 = vld [vmem:[#allocation2 + $0xc8] ss:$12 sps:$4 sm:$0xff]  }
  0x6b   :  { %1346 = vmatpush1.bf16.msra.mxu0 %v2478_v30  ;;  %v2549_v30 = vld [vmem:[#allocation2 + $0x2f0] ss:$12 sps:$4 sm:$0xff]  }
  0x6c   :  { %1387 = vmatpush1.bf16.msra.mxu1 %v2481_v31  ;;  %1347 = vmatprep.subr.bf16.mxu0 %v2486_v32  ;;  %v2550_v31 = vld [vmem:[#allocation2 + $0x8] ss:$12 sps:$4 sm:$0xff]   ;;  %v2813_v32 = vpack.c.bf16 %v76_v28, %v76_v28  ;;  %v2606_v28 = vld [vmem:[#allocation5] sm:$0xff]  }
  0x6d   :  { %1388 = vmatprep.subr.bf16.mxu1 %v2489_v33  ;;  %v2551_v33 = vld [vmem:[#allocation2 + $0x230] ss:$12 sps:$4 sm:$0xff]  }
  0x6f   :  { %1348 = vmatpush1.bf16.msra.mxu0 %v2484_v34  ;;  %v2552_v34 = vld [vmem:[#allocation2 + $0x2d8] ss:$12 sps:$4 sm:$0xff]  }
  0x70   :  { %1389 = vmatpush1.bf16.msra.mxu1 %v2487_v35  ;;  %1349 = vmatprep.subr.bf16.mxu0 %v2492_v36  ;;  %v2553_v35 = vld [vmem:[#allocation2 + $0x470] ss:$12 sps:$4 sm:$0xff]   ;;  %v2554_v36 = vld [vmem:[#allocation2 + $0x218] ss:$12 sps:$4 sm:$0xff]  }
  0x71   :  { %1390 = vmatprep.subr.bf16.mxu1 %v2495_v37  ;;  %v2555_v37 = vld [vmem:[#allocation2 + $0x3b0] ss:$12 sps:$4 sm:$0xff]  }
  0x73   :  { %1350 = vmatpush1.bf16.msra.mxu0 %v2490_v38  ;;  %v2556_v38 = vld [vmem:[#allocation2 + $0x2c0] ss:$12 sps:$4 sm:$0xff]  }
  0x74   :  { %1391 = vmatpush1.bf16.msra.mxu1 %v2493_v39  ;;  %1351 = vmatprep.subr.bf16.mxu0 %v2498_v40  ;;  %v2557_v39 = vld [vmem:[#allocation2 + $0x458] ss:$12 sps:$4 sm:$0xff]   ;;  %v2558_v40 = vld [vmem:[#allocation2 + $0x200] ss:$12 sps:$4 sm:$0xff]  }
  0x75   :  { %1392 = vmatprep.subr.bf16.mxu1 %v2501_v41  ;;  %v2559_v41 = vld [vmem:[#allocation2 + $0x398] ss:$12 sps:$4 sm:$0xff]  }
  0x77   :  { %1352 = vmatpush1.bf16.msra.mxu0 %v2496_v42  ;;  %v2560_v42 = vld [vmem:[#allocation2 + $0x2a8] ss:$12 sps:$4 sm:$0xff]  }
  0x78   :  { %1393 = vmatpush1.bf16.msra.mxu1 %v2499_v43  ;;  %1353 = vmatprep.subr.bf16.mxu0 %v2504_v44  ;;  %v2561_v43 = vld [vmem:[#allocation2 + $0x440] ss:$12 sps:$4 sm:$0xff]   ;;  %v2562_v44 = vld [vmem:[#allocation2 + $0x1e8] ss:$12 sps:$4 sm:$0xff]  }
  0x79   :  { %1394 = vmatprep.subr.bf16.mxu1 %v2507_v45  ;;  %v2563_v45 = vld [vmem:[#allocation2 + $0x380] ss:$12 sps:$4 sm:$0xff]  }
  0x7b   :  { %1354 = vmatpush1.bf16.msra.mxu0 %v2502_v47  ;;  %v2565_v47 = vld [vmem:[#allocation2 + $0x428] ss:$12 sps:$4 sm:$0xff]  }
  0x7c   :  { %1395 = vmatpush1.bf16.msra.mxu1 %v2505_v50  ;;  %1355 = vmatprep.subr.bf16.mxu0 %v2510_v53  ;;  %v2570_v50 = vld [vmem:[#allocation2 + $0x1b8] ss:$12 sps:$4 sm:$0xff]  }
  0x7d   :  { %2171 = vmatprep.subr.msk.bf16.mxu1 %vm1247_vm1, %v2169_v54  ;;  %v2573_v53 = vld [vmem:[#allocation2 + $0x3f8] ss:$12 sps:$4 sm:$0xff]   ;;  %v2574_v54 = vld [vmem:[#allocation2 + $0x1a0] ss:$12 sps:$4 sm:$0xff]  }
  0x7f   :  { %1356 = vmatpush2.bf16.msra.mxu0 %v2508_v55  ;;  %v2575_v55 = vld [vmem:[#allocation2 + $0x338] ss:$12 sps:$4 sm:$0xff]  }
  0x80   :  { %1411 = vmatpush2.bf16.msra.mxu1 %v1249_v61  ;;  %1357 = vmatprep.subr.bf16.mxu0 %v2515_v58  ;;  %v2577_v58 = vld [vmem:[#allocation2 + $0x3e0] ss:$12 sps:$4 sm:$0xff]  }
  0x81   :  { %2208 = vmatprep.subr.bf16.mxu1 %v2516_v62  ;;  %v2579_v61 = vld [vmem:[#allocation2 + $0x320] ss:$12 sps:$4 sm:$0xff]   ;;  %v2580_v62 = vld [vmem:[#allocation2 + $0x3c8] ss:$12 sps:$4 sm:$0xff]  }
  0x83   :  { %1413 = vmatmul.mubr.bf16.vlgmr.msra.gmra.mxu1 %v2807_v0  ;;  %1358 = vmatpush2.bf16.msra.mxu0 %v2513_v63  ;;  %v2581_v63 = vld [vmem:[#allocation2 + $0x308] ss:$12 sps:$4 sm:$0xff]  }
  0x84   :  { %2209 = vmatpush3.bf16.msra.mxu1 %v2517_v1  ;;  %1359 = vmatprep.subr.bf16.mxu0 %v2520_v2  ;;  %v2582_v1 = vld [vmem:[#allocation2 + $0x530] ss:$12 sps:$4 sm:$0xff]   ;;  %v2695_v2 = vmov 0  }
  0x85   :  { %2210 = vmatprep.subr.bf16.mxu1 %v2521_v3  ;;  %1453 = vmatprep.mubr.bf16.mxu1 %v2760_v56  ;;  %v2540_v56 = vld [vmem:[#allocation2 + $0x3dc] ss:$12 sps:$4 sm:$0xff]  }
  0x86   :  { %v2591_v3 = vld [vmem:[#allocation5 + $0x78] sm:$0xff]  }
  0x87   :  { %1360 = vmatpush2.bf16.msra.mxu0 %v2518_v4  ;;  %v2583_v4 = vld [vmem:[#allocation2 + $0x518] ss:$12 sps:$4 sm:$0xff]  }
  0x88   :  { %2211 = vmatpush3.bf16.msra.mxu1 %v2522_v5  ;;  %1361 = vmatprep.subr.bf16.mxu0 %v2525_v6  ;;  %v2592_v5 = vld [vmem:[#allocation5 + $0x38] sm:$0xff]   ;;  %v2593_v6 = vld [vmem:[#allocation5 + $0x70] sm:$0xff]  }
  0x89   :  { %2212 = vmatprep.subr.bf16.mxu1 %v2526_v7  ;;  %v2584_v7 = vld [vmem:[#allocation2 + $0x500] ss:$12 sps:$4 sm:$0xff]  }
  0x8b   :  { %1362 = vmatpush2.bf16.msra.mxu0 %v2523_v8  ;;  %v2594_v8 = vld [vmem:[#allocation5 + $0x30] sm:$0xff]  }
  0x8c   :  { %2213 = vmatpush3.bf16.msra.mxu1 %v2527_v9  ;;  %1363 = vmatprep.subr.bf16.mxu0 %v2530_v10  ;;  %v2595_v9 = vld [vmem:[#allocation5 + $0x68] sm:$0xff]  }
  0x8d   :  { %2214 = vmatprep.subr.bf16.mxu1 %v2531_v11  ;;  %v2596_v10 = vld [vmem:[#allocation5 + $0x28] sm:$0xff]   ;;  %v2597_v11 = vld [vmem:[#allocation5 + $0x60] sm:$0xff]  }
  0x8f   :  { %1364 = vmatpush2.bf16.msra.mxu0 %v2528_v13  ;;  %v2598_v13 = vld [vmem:[#allocation5 + $0x20] sm:$0xff]  }
  0x90   :  { %2215 = vmatpush3.bf16.msra.mxu1 %v2532_v14  ;;  %1365 = vmatprep.subr.bf16.mxu0 %v2535_v16  ;;  %v2599_v14 = vld [vmem:[#allocation5 + $0x58] sm:$0xff]  }
  0x91   :  { %2216 = vmatprep.subr.bf16.mxu1 %v2536_v17  ;;  %v2587_v16 = vld [vmem:[#allocation2 + $0x4b8] ss:$12 sps:$4 sm:$0xff]  }
  0x92   :  { %v2600_v17 = vld [vmem:[#allocation5 + $0x18] sm:$0xff]  }
  0x93   :  { %1366 = vmatpush2.bf16.msra.mxu0 %v2533_v18  ;;  %v2588_v18 = vld [vmem:[#allocation2 + $0x4a0] ss:$12 sps:$4 sm:$0xff]  }
  0x94   :  { %2217 = vmatpush3.bf16.msra.mxu1 %v2537_v19  ;;  %1367 = vmatprep.subr.bf16.mxu0 %v2540_v56  ;;  %v2589_v19 = vld [vmem:[#allocation2 + $0x488] ss:$12 sps:$4 sm:$0xff]  }
  0x95   :  { %2218 = vmatprep.subr.bf16.mxu1 %v2541_v20  ;;  %v2590_v56 = vld [vmem:[#allocation2 + $0x548] ss:$0 sps:$4 sm:$0x33]  }
  0x96   :  { %v1255_v20 = vsel %vm1247_vm1, %v2590_v56, 0 }
  0x97   :  { %1368 = vmatpush2.bf16.msra.mxu0 %v2538_v21  ;;  %v2601_v21 = vld [vmem:[#allocation5 + $0x50] sm:$0xff]  }
  0x98   :  { %2219 = vmatpush3.bf16.msra.mxu1 %v2542_v22  ;;  %1369 = vmatprep.subr.bf16.mxu0 %v2545_v23  ;;  %v2602_v22 = vld [vmem:[#allocation5 + $0x10] sm:$0xff]   ;;  %v2603_v23 = vld [vmem:[#allocation5 + $0x48] sm:$0xff]  }
  0x99   :  { %2220 = vmatprep.subr.bf16.mxu1 %v2546_v24  ;;  %v2604_v24 = vld [vmem:[#allocation5 + $0x8] sm:$0xff]  }
  0x9b   :  { %1370 = vmatpush2.bf16.msra.mxu0 %v2543_v25  ;;  %v324_v25 = vlaneseq }
  0x9c   :  { %2221 = vmatpush3.bf16.msra.mxu1 %v2547_v26  ;;  %2230 = vmatprep.subr.bf16.mxu0 %v2549_v30  ;;  %v2605_v26 = vld [vmem:[#allocation5 + $0x40] sm:$0xff]  }
  0x9d   :  { %2222 = vmatprep.subr.bf16.mxu1 %v2548_v29  ;;  %v325_v29 = vshrl.u32 %v324_v25, 7 }
  0x9e   :  { %1372 = vmatmul.mubr.bf16.vlgmr.msra.gmra.mxu0 %v2813_v32 }
  0x9f   :  { %2231 = vmatpush3.bf16.msra.mxu0 %v2551_v33  ;;  %1493 = vmatprep.mubr.bf16.mxu0 %v2762_v59  ;;  %v2566_v59 = vld [vmem:[#allocation2 + $0x1d0] ss:$12 sps:$4 sm:$0xff]   ;;  %v334_v30 = vsub.s32 2, %v325_v29  ;;  %v2607_v33 = vld [vmem:[#allocation5 + $0xb8] sm:$0xff]  }
  0xa0   :  { %2223 = vmatpush3.bf16.msra.mxu1 %v2550_v31  ;;  %2232 = vmatprep.subr.bf16.mxu0 %v2552_v34  ;;  %v322_v31 = vld [vmem:[%s2889_s2] sm:$0x7]  ;;  %v2696_v34 = vmov 0.0  }
  0xa1   :  { %2252 = vmatprep.subr.bf16.mxu1 %v2553_v35  ;;  %v2609_v35 = vld [vmem:[#allocation5 + $0xa8] sm:$0xff]  }
  0xa3   :  { %1454 = vmatmul.mubr.bf16.vlgmr.msra.gmra.mxu1 %v2766_v12  ;;  %2233 = vmatpush3.bf16.msra.mxu0 %v2554_v36  ;;  %v2568_v12 = vld [vmem:[#allocation2 + $0x278] ss:$12 sps:$4 sm:$0xff]   ;;  %v2610_v36 = vld [vmem:[#allocation5 + $0xa0] sm:$0xff]  }
  0xa4   :  { %2253 = vmatpush3.bf16.msra.mxu1 %v2555_v37  ;;  %2234 = vmatprep.subr.bf16.mxu0 %v2556_v38  ;;  %v2611_v37 = vld [vmem:[#allocation5 + $0x98] sm:$0xff]   ;;  %v2612_v38 = vld [vmem:[#allocation5 + $0x90] sm:$0xff]  }
  0xa5   :  { %2254 = vmatprep.subr.bf16.mxu1 %v2557_v39  ;;  %1533 = vmatprep.mubr.bf16.mxu1 %v2800_v57  ;;  %v2576_v57 = vld [vmem:[#allocation2 + $0x248] ss:$12 sps:$4 sm:$0xff]  }
  0xa7   :  { %2235 = vmatpush3.bf16.msra.mxu0 %v2558_v40 }
  0xa8   :  { %2255 = vmatpush3.bf16.msra.mxu1 %v2559_v41  ;;  %2236 = vmatprep.subr.bf16.mxu0 %v2560_v42 }
  0xa9   :  { %2256 = vmatprep.subr.bf16.mxu1 %v2561_v43  ;;  %v2613_v43 = vld [vmem:[#allocation5 + $0x88] sm:$0xff]  }
  0xab   :  { %2237 = vmatpush3.bf16.msra.mxu0 %v2562_v44 }
  0xac   :  { %2257 = vmatpush3.bf16.msra.mxu1 %v2563_v45  ;;  %2238 = vmatprep.subr.bf16.mxu0 %v2564_v46 }
  0xad   :  { %2258 = vmatprep.subr.bf16.mxu1 %v2565_v47 }
  0xaf   :  { %2239 = vmatpush3.bf16.msra.mxu0 %v2566_v59  ;;  %v2614_v59 = vld [vmem:[#allocation5 + $0x80] sm:$0xff]  }
  0xb0   :  { %2259 = vmatpush3.bf16.msra.mxu1 %v2567_v48  ;;  %2240 = vmatprep.subr.bf16.mxu0 %v2568_v12 }
  0xb1   :  { %2260 = vmatprep.subr.bf16.mxu1 %v2569_v49 }
  0xb3   :  { %2241 = vmatpush3.bf16.msra.mxu0 %v2570_v50 }
  0xb4   :  { %2261 = vmatpush3.bf16.msra.mxu1 %v2571_v51  ;;  %2242 = vmatprep.subr.bf16.mxu0 %v2572_v52  ;;  %v326_v51 = vsub.s32 0, %v325_v29  ;;  %v330_v52 = vsub.s32 1, %v325_v29 }
  0xb5   :  { %2262 = vmatprep.subr.bf16.mxu1 %v2573_v53 }
  0xb6   :  { %v327_v53 = vrot.slane %v322_v31, %v326_v51 }
  0xb7   :  { %2243 = vmatpush3.bf16.msra.mxu0 %v2574_v54  ;;  %v331_v54 = vrot.slane %v322_v31, %v330_v52 }
  0xb8   :  { %2263 = vmatpush3.bf16.msra.mxu1 %v2575_v55  ;;  %2244 = vmatprep.subr.bf16.mxu0 %v2576_v57 }
  0xb9   :  { %2264 = vmatprep.subr.bf16.mxu1 %v2577_v58 }
  0xbb   :  { %2245 = vmatpush3.bf16.msra.mxu0 %v2578_v60 }
  0xbc   :  { %2265 = vmatpush3.bf16.msra.mxu1 %v2579_v61  ;;  %1541 = vmatprep.subr.bf16.mxu0 %v2695_v2 }
  0xbd   :  { %2266 = vmatprep.subr.bf16.mxu1 %v2580_v62 }
  0xbe   :  { %1494 = vmatmul.mubr.bf16.vlgmr.msra.gmra.mxu0 %v2768_v15  ;;  %v2585_v15 = vld [vmem:[#allocation2 + $0x4e8] ss:$12 sps:$4 sm:$0xff]  }
  0xbf   :  { %1542 = vmatpush1.bf16.msra.mxu0 %v2582_v1  ;;  %2173 = vmatprep.mubr.msk.bf16.mxu0 %vm1243_vm0, %v2784_v27  ;;  %v2586_v27 = vld [vmem:[#allocation2 + $0x4d0] ss:$12 sps:$4 sm:$0xff]  }
  0xc0   :  { %2267 = vmatpush3.bf16.msra.mxu1 %v2581_v63  ;;  %1543 = vmatprep.subr.bf16.mxu0 %v2695_v2 }
  0xc1   :  { %2274 = vmatprep.subr.bf16.mxu1 %v2591_v3 }
  0xc3   :  { %1534 = vmatmul.mubr.bf16.vlgmr.msra.gmra.mxu1 %v2813_v32  ;;  %1544 = vmatpush1.bf16.msra.mxu0 %v2583_v4  ;;  %v2828_v32 = vrot.slane %v322_v31, %v334_v30 }
  0xc4   :  { %2275 = vmatpush3.bf16.msra.mxu1 %v2592_v5  ;;  %1545 = vmatprep.subr.bf16.mxu0 %v2695_v2 }
  0xc5   :  { %2276 = vmatprep.subr.bf16.mxu1 %v2593_v6 }
  0xc7   :  { %1546 = vmatpush1.bf16.msra.mxu0 %v2584_v7 }
  0xc8   :  { %2277 = vmatpush3.bf16.msra.mxu1 %v2594_v8  ;;  %1547 = vmatprep.subr.bf16.mxu0 %v2695_v2 }
  0xc9   :  { %2278 = vmatprep.subr.bf16.mxu1 %v2595_v9 }
  0xcb   :  { %1548 = vmatpush1.bf16.msra.mxu0 %v2585_v15 }
  0xcc   :  { %2279 = vmatpush3.bf16.msra.mxu1 %v2596_v10  ;;  %1549 = vmatprep.subr.bf16.mxu0 %v2695_v2 }
  0xcd   :  { %2280 = vmatprep.subr.bf16.mxu1 %v2597_v11 }
  0xcf   :  { %1550 = vmatpush1.bf16.msra.mxu0 %v2586_v27 }
  0xd0   :  { %2281 = vmatpush3.bf16.msra.mxu1 %v2598_v13  ;;  %1551 = vmatprep.subr.bf16.mxu0 %v2695_v2 }
  0xd1   :  { %2282 = vmatprep.subr.bf16.mxu1 %v2599_v14 }
  0xd3   :  { %1552 = vmatpush1.bf16.msra.mxu0 %v2587_v16 }
  0xd4   :  { %2283 = vmatpush3.bf16.msra.mxu1 %v2600_v17  ;;  %1553 = vmatprep.subr.bf16.mxu0 %v2695_v2 }
  0xd5   :  { %2284 = vmatprep.subr.bf16.mxu1 %v2601_v21 }
  0xd7   :  { %1554 = vmatpush1.bf16.msra.mxu0 %v2588_v18 }
  0xd8   :  { %1555 = vmatprep.subr.bf16.mxu0 %v2695_v2  ;;  %2285 = vmatpush3.bf16.msra.mxu1 %v2602_v22 }
  0xd9   :  { %2286 = vmatprep.subr.bf16.mxu1 %v2603_v23 }
  0xdb   :  { %1556 = vmatpush1.bf16.msra.mxu0 %v2589_v19 }
  0xdc   :  { %1571 = vmatprep.subr.bf16.mxu0 %v2695_v2  ;;  %2287 = vmatpush3.bf16.msra.mxu1 %v2604_v24 }
  0xdd   :  { %2288 = vmatprep.subr.bf16.mxu1 %v2605_v26 }
  0xdf   :  { %1572 = vmatpush2.bf16.msra.mxu0 %v1255_v20 }
  0xe0   :  { %2289 = vmatpush3.bf16.msra.mxu1 %v2606_v28  ;;  %2314 = vmatprep.subr.bf16.mxu0 %v2696_v34 }
  0xe1   :  { %2334 = vmatprep.subr.bf16.mxu1 %v2696_v34 }
  0xe2   :  { %1574 = vmatmul.mubr.bf16.vlgmr.msra.gmra.mxu0 %v2807_v0  ;;  %v2608_v0 = vld [vmem:[#allocation5 + $0xb0] sm:$0xff]  }
  0xe3   :  { %2315 = vmatpush3.bf16.msra.mxu0 %v2607_v33  ;;  %2330 = vmatprep.mubr.msk.bf16.mxu0 %vm2697_vm2, %v2696_v34 }
  0xe4   :  { %2316 = vmatprep.subr.bf16.mxu0 %v2696_v34 }
  0xe7   :  { %2317 = vmatpush3.bf16.msra.mxu0 %v2608_v0 }
  0xe8   :  { %2318 = vmatprep.subr.bf16.mxu0 %v2696_v34 }
  0xeb   :  { %2319 = vmatpush3.bf16.msra.mxu0 %v2609_v35 }
  0xec   :  { %2320 = vmatprep.subr.bf16.mxu0 %v2696_v34 }
  0xef   :  { %2321 = vmatpush3.bf16.msra.mxu0 %v2610_v36  ;;  %v2615_v36 = vld [vmem:[%s2892_s5 + $0x38] sm:$0xff]  }
  0xf0   :  { %2322 = vmatprep.subr.bf16.mxu0 %v2696_v34 }
  0xf3   :  { %2323 = vmatpush3.bf16.msra.mxu0 %v2611_v37  ;;  %v2617_v37 = vld [vmem:[%s2892_s5 + $0x28] sm:$0xff]  }
  0xf4   :  { %2324 = vmatprep.subr.bf16.mxu0 %v2696_v34 }
  0xf7   :  { %2325 = vmatpush3.bf16.msra.mxu0 %v2612_v38  ;;  %v2618_v38 = vld [vmem:[%s2892_s5 + $0x20] sm:$0xff]  }
  0xf8   :  { %2326 = vmatprep.subr.bf16.mxu0 %v2696_v34 }
  0xfb   :  { %2327 = vmatpush3.bf16.msra.mxu0 %v2613_v43 }
  0xfc   :  { %2328 = vmatprep.subr.bf16.mxu0 %v2696_v34 }
  0xff   :  { %2329 = vmatpush3.bf16.msra.mxu0 %v2614_v59  ;;  %v2174_v59 = vld [vmem:[%s2891_s4] ss:$0 sm:$0xff] }
 0x11e   :  { %v1291_v39 = vpop.f32.mrf.mxu0 }
 0x11f   :  { %v1332_v40 = vpop.f32.mrf.mxu1  ;;  %v1292_v55 = vadd.f32 %v1291_v39, %v327_v53  ;;  %v2619_v39 = vld [vmem:[%s2892_s5 + $0x18] sm:$0xff]  }
 0x120   :  { %v1293_v41 = vpop.f32.mrf.mxu0 }
 0x121   :  { %v1334_v42 = vpop.f32.mrf.mxu1  ;;  %v1294_v57 = vadd.f32 %v1293_v41, %v331_v54  ;;  %v1333_v58 = vadd.f32 %v1332_v40, %v1292_v55  ;;  %v2620_v40 = vld [vmem:[%s2892_s5 + $0x10] sm:$0xff]   ;;  %v2621_v41 = vld [vmem:[%s2892_s5 + $0x8] sm:$0xff]   ;;  %v2199_v54 = vld [vmem:[%s2893_s6] ss:$0 sm:$0xff] }
 0x122   :  { %v1295_v44 = vpop.f32.mrf.mxu0 }
 0x123   :  { %v1336_v45 = vpop.f32.mrf.mxu1  ;;  %v1335_v61 = vadd.f32 %v1334_v42, %v1294_v57  ;;  %v2622_v42 = vld [vmem:[%s2892_s5] sm:$0xff]  }
 0x124   :  { %v1296_v46 = vpop.f32.mrf.mxu0 }
 0x125   :  { %v1337_v47 = vpop.f32.mrf.mxu1 }
 0x143   :  { %v1414_v48 = vpop.f32.mrf.mxu1 }
 0x145   :  { %v1416_v12 = vpop.f32.mrf.mxu1 }
 0x147   :  { %v1418_v49 = vpop.f32.mrf.mxu1 }
 0x149   :  { %v1419_v50 = vpop.f32.mrf.mxu1 }
 0x15e   :  { %v1373_v60 = vpop.f32.mrf.mxu0 }
 0x15f   :  { %v1374_v62 = vadd.f32 %v1373_v60, %v1333_v58 }
 0x160   :  { %v1375_v63 = vpop.f32.mrf.mxu0 }
 0x161   :  { %v1415_v1 = vadd.f32 %v1414_v48, %v1374_v62  ;;  %v1376_v2 = vadd.f32 %v1375_v63, %v1335_v61 }
 0x162   :  { %v1377_v3 = vpop.f32.mrf.mxu0 }
 0x163   :  { %v2224_v4 = vpop.f32.mrf.mxu1  ;;  %v1417_v5 = vadd.f32 %v1416_v12, %v1376_v2  ;;  %v1581_v6 = vmax.f32 %v1415_v1, 0.0 }
 0x164   :  { %v1378_v7 = vpop.f32.mrf.mxu0 }
 0x165   :  { %v2225_v8 = vpop.f32.mrf.mxu1  ;;  %v1582_v9 = vmax.f32 %v1417_v5, 0.0  ;;  %v1584_v11 = vpack.c.bf16 %v1581_v6, %v1581_v6 }
 0x166   :  { %v2226_v21 = vadd.f32 %v2225_v8, %v2224_v4 }
 0x167   :  { %v2227_v15 = vpop.f32.mrf.mxu1  ;;  %v1585_v10 = vpack.c.bf16 %v1582_v9, %v1582_v9 }
 0x168   :  { %v1456_v22 = vadd.f32 %v2226_v21, %v2828_v32  ;;  %v2616_v32 = vld [vmem:[%s2892_s5 + $0x30] sm:$0xff]  }
 0x169   :  { %v2228_v27 = vpop.f32.mrf.mxu1  ;;  %1818 = vmatprep.mubr.bf16.mxu1 %v1585_v10 }
 0x16a   :  { %1819 = vmatmul.mubr.bf16.vlgmr.msra.gmra.mxu1 %v1584_v11 }
 0x16b   :  { %2350 = vmatprep.mubr.msk.bf16.mxu1 %vm2697_vm2, %v2696_v34  ;;  %2335 = vmatpush3.bf16.msra.mxu1 %v2615_v36 }
 0x16c   :  { %2336 = vmatprep.subr.bf16.mxu1 %v2696_v34 }
 0x16f   :  { %2337 = vmatpush3.bf16.msra.mxu1 %v2616_v32 }
 0x170   :  { %2338 = vmatprep.subr.bf16.mxu1 %v2696_v34 }
 0x173   :  { %2339 = vmatpush3.bf16.msra.mxu1 %v2617_v37 }
 0x174   :  { %2340 = vmatprep.subr.bf16.mxu1 %v2696_v34 }
 0x177   :  { %2341 = vmatpush3.bf16.msra.mxu1 %v2618_v38 }
 0x178   :  { %2342 = vmatprep.subr.bf16.mxu1 %v2696_v34 }
 0x17b   :  { %2343 = vmatpush3.bf16.msra.mxu1 %v2619_v39 }
 0x17c   :  { %2344 = vmatprep.subr.bf16.mxu1 %v2696_v34 }
 0x17e   :  { %v2246_v13 = vpop.f32.mrf.mxu0 }
 0x17f   :  { %2345 = vmatpush3.bf16.msra.mxu1 %v2620_v40 }
 0x180   :  { %v2247_v14 = vpop.f32.mrf.mxu0  ;;  %2346 = vmatprep.subr.bf16.mxu1 %v2696_v34 }
 0x181   :  { %v2248_v23 = vadd.f32 %v2247_v14, %v2246_v13 }
 0x182   :  { %v2249_v16 = vpop.f32.mrf.mxu0 }
 0x183   :  { %v2268_v17 = vpop.f32.mrf.mxu1  ;;  %v1496_v25 = vadd.f32 %v2248_v23, %v1456_v22  ;;  %2347 = vmatpush3.bf16.msra.mxu1 %v2621_v41 }
 0x184   :  { %v2250_v18 = vpop.f32.mrf.mxu0  ;;  %2348 = vmatprep.subr.bf16.mxu1 %v2696_v34 }
 0x185   :  { %v2269_v19 = vpop.f32.mrf.mxu1 }
 0x186   :  { %v2270_v24 = vadd.f32 %v2269_v19, %v2268_v17 }
 0x187   :  { %v2271_v56 = vpop.f32.mrf.mxu1  ;;  %2349 = vmatpush3.bf16.msra.mxu1 %v2622_v42 }
 0x188   :  { %v1536_v26 = vadd.f32 %v2270_v24, %v1496_v25 }
 0x189   :  { %v2272_v20 = vpop.f32.mrf.mxu1 }
 0x1a2   :  { %v1575_v28 = vpop.f32.mrf.mxu0 }
 0x1a3   :  { %v1576_v29 = vadd.f32 %v1575_v28, %v1536_v26 }
 0x1a4   :  { %v1577_v30 = vpop.f32.mrf.mxu0 }
 0x1a5   :  { %v1583_v31 = vmax.f32 %v1576_v29, 0.0 }
 0x1a6   :  { %v1578_v33 = vpop.f32.mrf.mxu0 }
 0x1a7   :  { %v1586_v0 = vpack.c.bf16 %v1583_v31, %v1583_v31 }
 0x1a8   :  { %v1579_v35 = vpop.f32.mrf.mxu0 }
 0x1a9   :  { %2331 = vmatmul.mubr.bf16.vlgmr.msra.gmra.mxu0 %v1586_v0 }
 0x22a   :  { %v2290_v43 = vpop.f32.mrf.mxu1 }
 0x22c   :  { %v2291_v44 = vpop.f32.mrf.mxu1 }
 0x22d   :  { %v2292_v47 = vadd.f32 %v2291_v44, %v2290_v43 }
 0x22e   :  { %v2293_v45 = vpop.f32.mrf.mxu1 }
 0x22f   :  { %v1821_v48 = vadd.f32 %v2292_v47, %v2174_v59 }
 0x230   :  { %v2294_v46 = vpop.f32.mrf.mxu1 }
 0x269   :  { %v1860_v12 = vpop.f32.mrf.mxu0 }
 0x26a   :  { %v1861_v49 = vadd.f32 %v1860_v12, %v1821_v48 }
 0x26b   :  { %v2332_v50 = vpop.f32.mrf.mxu0 }
 0x26c   :  { %v1866_v51 = vmax.f32 %v1861_v49, 0.0 }
 0x26d   :  { %v1863_v34 = vpop.f32.mrf.mxu0 }
 0x26e   :  { %v1867_v52 = vpack.c.bf16 %v1866_v51, %v1866_v51 }
 0x26f   :  { %v2333_v53 = vpop.f32.mrf.mxu0 }
 0x270   :  { %2351 = vmatmul.mubr.bf16.vlgmr.msra.gmra.mxu1 %v1867_v52 }
 0x330   :  { %v1973_v55 = vpop.f32.mrf.mxu1 }
 0x331   :  { %v1974_v57 = vadd.f32 %v2199_v54, %v1973_v55 }
 0x332   :  { %v2352_v58 = vpop.f32.mrf.mxu1 }
 0x333   :  { %v1979_v60 = vmax.f32 %v1974_v57, 0.0 }
 0x334   :  { %v1976_v61 = vpop.f32.mrf.mxu1 }
 0x335   :  { %1981 = vst.msk [vmem:[#allocation7] sm:$0xff] %vm1980_vm3, %v1979_v60 }
 0x336   :  { %v2353_v62 = vpop.f32.mrf.mxu1 }
 0x337   :  { %1986 = vsyncadd [#allocation4], 64  ;;  %s2698_s4 = smov [#allocation7]  }
 0x338   :  { %s1987_s25 = sshll.u32 %s2698_s4, 4  ;;  %s1988_s25 = int_to_ptr.vmem [resolvable:$true] %s1987_s25 }
 0x339   :  { %s2663_s26 = scalar_lea.vmem %s1988_s25, 64  ;;  %s2667_s27 = scalar_lea.vmem %s1988_s25, 128 }
 0x33a   :  { %p2664_p10 = scmp.ne.s32.totalorder %s1988_s25, %s2663_s26  ;;  %p2668_p11 = scmp.lt.s32.totalorder %s1988_s25, %s1988_s25 }
 0x33b   :  { %p2669_p12 = scmp.lt.s32.totalorder %s2667_s27, %s2663_s26 }
 0x33d   :  { %p2670_p13 = por %p2669_p12, %p2668_p11 }
 0x33f   :  { %p2671_p0 = pnand %p2670_p13, %p2664_p10 }
 0x341   :  { %2674 = shalt.err (!%p2671_p0)
}
 0x342   :  { %1993 = dma.vmem_to_hbm [thread:$0]  %s1988_s25, 64, %s2894_s7, [#allocation4], %s2693_s11, %s2693_s11, %s2694_s12  }
 0x343   :  { %2687 = dma.done.wait [#allocation4], 128  }
 0x344   :  { %2688 = vsyncadd [#allocation4], 4294967168 }
 0x345   :  { %1997 = vsyncpa [#allocation3], 1 }
 0x346   :  { %1998 = vsyncpa [#allocation6], 1 }
 0x347   :  { %1999 = vsyncpa [#allocation4], 1 }

</bundles_post_ra>
